<compile_context>
chip_gen: v5e
topology: v5e:2x2
jax: 0.10.0
libtpu: 0.0.40
codegen_flags: <defaults>
</compile_context>

<pallas_src>
import collections
import functools

import jax
import jax.numpy as jnp
from jax.experimental import pallas as pl
from jax.experimental.pallas import tpu as pltpu


def _round_up(x, m):
    return (x + m - 1) // m * m


NCFParams = collections.namedtuple(
    "NCFParams", ["w1u", "w1i", "b1", "hidden", "wo", "bo"])


def _make_ncf_kernel(n_relu_layers):
    """n_relu_layers = number of Linear+ReLU layers (== len(mlp_layers))."""

    def kernel(*refs):
        u_ref, it_ref, gmf_ref = refs[:3]
        w1u_ref, w1i_ref, b1_ref = refs[3:6]
        pos = 6
        hidden = []
        for _ in range(n_relu_layers - 1):
            hidden.append((refs[pos], refs[pos + 1]))
            pos += 2
        wo_ref, bo_ref = refs[pos], refs[pos + 1]
        o_ref, z_sc = refs[pos + 2], refs[pos + 3]

        # ---- MLP logit for this i-tile: compute once (j == 0), keep in VMEM ----
        @pl.when(pl.program_id(1) == 0)
        def _():
            # concat([u, it]) @ W1  ==  u @ W1[:E] + it @ W1[E:]  (no concat copy)
            h = jnp.dot(u_ref[...], w1u_ref[...], preferred_element_type=jnp.float32)
            h = h + jnp.dot(it_ref[...], w1i_ref[...], preferred_element_type=jnp.float32)
            h = jnp.maximum(h + b1_ref[...], 0.0)          # bias + ReLU in f32 (VPU)
            for w_ref, b_ref in hidden:
                h = jnp.dot(h.astype(w_ref.dtype), w_ref[...],
                            preferred_element_type=jnp.float32)
                h = jnp.maximum(h + b_ref[...], 0.0)
            z = jnp.dot(h.astype(wo_ref.dtype), wo_ref[...],
                        preferred_element_type=jnp.float32)
            z_sc[...] = z + bo_ref[...]                    # (tb_i, 1)

        # ---- torch broadcast: (tb_i,1) + (1,tb_j) -> (tb_i,tb_j), tanh-sigmoid ----
        logits = z_sc[...] + gmf_ref[...]
        o_ref[...] = (0.5 * jnp.tanh(0.5 * logits) + 0.5).astype(o_ref.dtype)

    return kernel


def prepare_ncf_params(user_emb, item_emb, Ws, bs, mxu_dtype=jnp.bfloat16):
    """One-time prep (hoisted out of the per-call forward): pad hidden widths to
    lane multiples (128), split the concat matmul, cast matmul operands."""
    E = user_emb.shape[1]
    dims = [2 * E] + [int(W.shape[1]) for W in Ws]                  # [2E, H1, ..., 1]
    pdims = [dims[0]] + [_round_up(d, 128) for d in dims[1:-1]] + [dims[-1]]
    Wp = [jnp.pad(W, ((0, pdims[l] - dims[l]), (0, pdims[l + 1] - dims[l + 1])))
          for l, W in enumerate(Ws)]
    bp = [jnp.pad(b, ((0, 0), (0, pdims[l + 1] - dims[l + 1])))
          for l, b in enumerate(bs)]
    md = mxu_dtype
    w1u = Wp[0][:E].astype(md)                                       # split the concat
    w1i = Wp[0][E:].astype(md)
    hidden = tuple((Wp[l].astype(md), bp[l].astype(jnp.float32))
                   for l in range(1, len(Ws) - 1))
    return NCFParams(w1u=w1u, w1i=w1i, b1=bp[0].astype(jnp.float32),
                     hidden=hidden,
                     wo=Wp[-1].astype(md), bo=bp[-1].astype(jnp.float32))


def ncf_forward(user_idx, item_idx, user_emb, item_emb, params, *,
                out_dtype=jnp.float32, tb_i=None, tb_j=None):
    """NCF forward. `params` comes from prepare_ncf_params (padded, pre-cast)."""
    E = user_emb.shape[1]
    B = user_idx.shape[0]
    md = params.w1u.dtype
    n_relu = 1 + len(params.hidden)        # number of Linear+ReLU layers

    # TODO(synk): the embedding lookup is a data-dependent per-row gather; it is
    # done with XLA take() here (a per-row gather does not map onto BlockSpec tiling).
    u = jnp.take(user_emb, user_idx, axis=0).astype(jnp.float32)    # (B, E)
    it = jnp.take(item_emb, item_idx, axis=0).astype(jnp.float32)   # (B, E)

    # GMF hoisted to the wrapper: f32, computed once, fuses with the gather.
    gmf = jnp.sum(u * it, axis=1)[None, :]                           # (1, B) f32

    # Row (i) tile: 256 only when >=2 i-tiles remain so v7x's 2 TCs both get work;
    # keep tb_i=128 on v5e (4x128 MXU) via the tb_i argument if desired.
    if tb_i is None:
        if B >= 512:
            tb_i = 256
        elif B >= 128:
            tb_i = 128
        else:
            tb_i = _round_up(B, 8)
    # Column (j, lane) tile: always >=128 (unmasked lane-dense stores), enlarged
    # up to 2048 so the per-grid-step output write amortizes step overhead while
    # the double-buffered out tile stays small vs. v7x's 64 MiB VMEM.
    b_pad128 = _round_up(B, 128)
    if tb_j is None:
        tb_j = min(b_pad128, 2048)
    B_pad_i = _round_up(B, tb_i)
    B_pad_j = _round_up(b_pad128, tb_j)

    u_p = jnp.pad(u, ((0, B_pad_i - B), (0, 0))).astype(md)
    it_p = jnp.pad(it, ((0, B_pad_i - B), (0, 0))).astype(md)
    gmf_p = jnp.pad(gmf, ((0, 0), (0, B_pad_j - B)))                 # stays f32

    H1 = params.w1u.shape[1]
    args = [u_p, it_p, gmf_p, params.w1u, params.w1i, params.b1]
    # NOTE: constant-index weight specs could use pipeline_mode=pl.Buffered(1)
    # to drop their redundant double-buffer; negligible at these widths.
    in_specs = [
        pl.BlockSpec((tb_i, E), lambda i, j: (i, 0)),        # u rows for the MLP
        pl.BlockSpec((tb_i, E), lambda i, j: (i, 0)),        # item rows for the MLP
        pl.BlockSpec((1, tb_j), lambda i, j: (0, j)),        # precomputed GMF (f32)
        pl.BlockSpec((E, H1), lambda i, j: (0, 0)),          # W1 (user half), resident
        pl.BlockSpec((E, H1), lambda i, j: (0, 0)),          # W1 (item half)
        pl.BlockSpec((1, H1), lambda i, j: (0, 0)),          # b1
    ]
    for W, b in params.hidden:
        args += [W, b]
        in_specs += [pl.BlockSpec(W.shape, lambda i, j: (0, 0)),
                     pl.BlockSpec(b.shape, lambda i, j: (0, 0))]
    args += [params.wo, params.bo]
    in_specs += [pl.BlockSpec(params.wo.shape, lambda i, j: (0, 0)),
                 pl.BlockSpec(params.bo.shape, lambda i, j: (0, 0))]

    out = pl.pallas_call(
        _make_ncf_kernel(n_relu),
        out_shape=jax.ShapeDtypeStruct((B_pad_i, B_pad_j), out_dtype),
        grid_spec=pltpu.PrefetchScalarGridSpec(
            num_scalar_prefetch=0,
            grid=(B_pad_i // tb_i, B_pad_j // tb_j),
            in_specs=in_specs,
            out_specs=pl.BlockSpec((tb_i, tb_j), lambda i, j: (i, j)),
            scratch_shapes=[pltpu.VMEM((tb_i, 1), jnp.float32)],
        ),
        compiler_params=pltpu.CompilerParams(
            dimension_semantics=("parallel", "arbitrary"),
            vmem_limit_bytes=48 * 1024 * 1024),
    )(*args)
    return out[:B, :B]


def ncf_reference(user_idx, item_idx, user_emb, item_emb, Ws, bs):
    """Plain-JAX reference with the same (literal) torch semantics."""
    u = user_emb[user_idx]
    it = item_emb[item_idx]
    gmf = jnp.sum(u * it, axis=1)                      # (B,)
    h = jnp.concatenate([u, it], axis=1)
    for W, b in zip(Ws[:-1], bs[:-1]):
        h = jnp.maximum(h @ W + b, 0.0)
    z = h @ Ws[-1] + bs[-1]                            # (B, 1)
    return jax.nn.sigmoid(z + gmf)                     # (B,1)+(B,) -> (B,B), as in torch


def init_ncf_params(key, num_users, num_items, embed_size, mlp_layers):
    """Mimics nn.Embedding (normal) and nn.Linear (uniform +-1/sqrt(fan_in)) init.
    Weights are stored (in, out) so the kernel computes x @ W + b."""
    n_lin = len(mlp_layers) + 1
    keys = jax.random.split(key, 2 + 2 * n_lin)
    user_emb = jax.random.normal(keys[0], (num_users, embed_size), jnp.float32)
    item_emb = jax.random.normal(keys[1], (num_items, embed_size), jnp.float32)
    # NOTE: the torch module defines self.gmf = nn.Embedding(...) but never uses
    # it in forward(), so it is not materialized here.
    dims = [2 * embed_size] + list(mlp_layers) + [1]
    Ws, bs = [], []
    for l in range(n_lin):
        fan_in, fan_out = dims[l], dims[l + 1]
        s = 1.0 / (fan_in ** 0.5)
        Ws.append(jax.random.uniform(keys[2 + 2 * l], (fan_in, fan_out), jnp.float32, -s, s))
        bs.append(jax.random.uniform(keys[3 + 2 * l], (1, fan_out), jnp.float32, -s, s))
    return user_emb, item_emb, Ws, bs


if __name__ == "__main__":
    num_users, num_items, embed_size = 64, 64, 32
    mlp_layers = [64, 32]
    batch = 8

    key = jax.random.PRNGKey(0)
    kp, ku, ki = jax.random.split(key, 3)
    user_emb, item_emb, Ws, bs = init_ncf_params(kp, num_users, num_items,
                                                 embed_size, mlp_layers)
    user_idx = jax.random.randint(ku, (batch,), 0, num_users, dtype=jnp.int32)
    item_idx = jax.random.randint(ki, (batch,), 0, num_items, dtype=jnp.int32)

    # One-time weight prep (padding + cast) hoisted out of the forward pass.
    params_bf16 = prepare_ncf_params(user_emb, item_emb, Ws, bs, mxu_dtype=jnp.bfloat16)
    params_f32 = prepare_ncf_params(user_emb, item_emb, Ws, bs, mxu_dtype=jnp.float32)

    fwd = jax.jit(ncf_forward)

    # Primary (bf16 MXU operands, f32 GMF / accumulation / output).
    out = jax.block_until_ready(fwd(user_idx, item_idx, user_emb, item_emb, params_bf16))
    # f32-MXU variant for a tighter numerical check.
    out_f32 = jax.block_until_ready(fwd(user_idx, item_idx, user_emb, item_emb, params_f32))
    # bf16-output variant (halved HBM writeback of the (B,B) result).
    fwd_bf16out = jax.jit(functools.partial(ncf_forward, out_dtype=jnp.bfloat16))
    out_bf = jax.block_until_ready(
        fwd_bf16out(user_idx, item_idx, user_emb, item_emb, params_bf16))

    ref = ncf_reference(user_idx, item_idx, user_emb, item_emb, Ws, bs)
    assert out.shape == (batch, batch), out.shape
    assert out_bf.shape == (batch, batch), out_bf.shape
    assert jnp.allclose(out_f32, ref, atol=1e-2, rtol=1e-2), \
        float(jnp.max(jnp.abs(out_f32 - ref)))
    assert jnp.allclose(out, ref, atol=5e-2, rtol=5e-2), \
        float(jnp.max(jnp.abs(out - ref)))
    assert jnp.allclose(out_bf.astype(jnp.float32), ref, atol=5e-2, rtol=5e-2), \
        float(jnp.max(jnp.abs(out_bf.astype(jnp.float32) - ref)))
    print("KERNEL_OK")
</pallas_src>

<mosaic_0001>
module attributes {stable_mosaic.version = 11 : i64} {
  func.func @kernel(%arg0: i32, %arg1: i32, %arg2: memref<8x32xbf16, #tpu.memory_space<vmem>>, %arg3: memref<8x32xbf16, #tpu.memory_space<vmem>>, %arg4: memref<1x128xf32, #tpu.memory_space<vmem>>, %arg5: memref<32x128xbf16, #tpu.memory_space<vmem>>, %arg6: memref<32x128xbf16, #tpu.memory_space<vmem>>, %arg7: memref<1x128xf32, #tpu.memory_space<vmem>>, %arg8: memref<128x128xbf16, #tpu.memory_space<vmem>>, %arg9: memref<1x128xf32, #tpu.memory_space<vmem>>, %arg10: memref<128x1xbf16, #tpu.memory_space<vmem>>, %arg11: memref<1x1xf32, #tpu.memory_space<vmem>>, %arg12: memref<8x128xf32, #tpu.memory_space<vmem>>, %arg13: memref<8x1xf32, #tpu.memory_space<vmem>>) attributes {dimension_semantics = [#tpu.dimension_semantics<parallel>, #tpu.dimension_semantics<arbitrary>], iteration_bounds = array<i64: 1, 1>, scalar_prefetch = 0 : i64, scratch_operands = 1 : i64, tpu.core_type = #tpu.core_type<tc>, window_params = [{transform_indices = @transform_0, window_bounds = array<i64: 8, 32>}, {transform_indices = @transform_1, window_bounds = array<i64: 8, 32>}, {transform_indices = @transform_2, window_bounds = array<i64: 1, 128>}, {pipeline_mode = #tpu.pipeline_mode<synchronous>, transform_indices = @transform_3, window_bounds = array<i64: 32, 128>}, {pipeline_mode = #tpu.pipeline_mode<synchronous>, transform_indices = @transform_4, window_bounds = array<i64: 32, 128>}, {pipeline_mode = #tpu.pipeline_mode<synchronous>, transform_indices = @transform_5, window_bounds = array<i64: 1, 128>}, {pipeline_mode = #tpu.pipeline_mode<synchronous>, transform_indices = @transform_6, window_bounds = array<i64: 128, 128>}, {pipeline_mode = #tpu.pipeline_mode<synchronous>, transform_indices = @transform_7, window_bounds = array<i64: 1, 128>}, {pipeline_mode = #tpu.pipeline_mode<synchronous>, transform_indices = @transform_8, window_bounds = array<i64: 128, 1>}, {pipeline_mode = #tpu.pipeline_mode<synchronous>, transform_indices = @transform_9, window_bounds = array<i64: 1, 1>}, {transform_indices = @transform_10, window_bounds = array<i64: 8, 128>}]} {
    %c0_i32 = arith.constant 0 : i32
    %0 = arith.cmpi eq, %arg1, %c0_i32 : i32
    %1 = arith.extui %0 : i1 to i32
    %c0_i32_0 = arith.constant 0 : i32
    %2 = arith.cmpi ne, %1, %c0_i32_0 : i32
    scf.if %2 {
      %c0_8 = arith.constant 0 : index
      %c0_9 = arith.constant 0 : index
      %16 = vector.load %arg2[%c0_8, %c0_9] : memref<8x32xbf16, #tpu.memory_space<vmem>>, vector<8x32xbf16>
      %c0_10 = arith.constant 0 : index
      %c0_11 = arith.constant 0 : index
      %17 = vector.load %arg5[%c0_10, %c0_11] : memref<32x128xbf16, #tpu.memory_space<vmem>>, vector<32x128xbf16>
      %cst_12 = arith.constant dense<0.000000e+00> : vector<8x128xf32>
      %18 = tpu.matmul %16, %17, %cst_12 {dimension_numbers = #tpu.dot_dimension_numbers<[1], [0], [0], [1], [0, 0, 1, 1], [], []>} : vector<8x32xbf16>, vector<32x128xbf16>, vector<8x128xf32> -> vector<8x128xf32>
      %c0_13 = arith.constant 0 : index
      %c0_14 = arith.constant 0 : index
      %19 = vector.load %arg3[%c0_13, %c0_14] : memref<8x32xbf16, #tpu.memory_space<vmem>>, vector<8x32xbf16>
      %c0_15 = arith.constant 0 : index
      %c0_16 = arith.constant 0 : index
      %20 = vector.load %arg6[%c0_15, %c0_16] : memref<32x128xbf16, #tpu.memory_space<vmem>>, vector<32x128xbf16>
      %cst_17 = arith.constant dense<0.000000e+00> : vector<8x128xf32>
      %21 = tpu.matmul %19, %20, %cst_17 {dimension_numbers = #tpu.dot_dimension_numbers<[1], [0], [0], [1], [0, 0, 1, 1], [], []>} : vector<8x32xbf16>, vector<32x128xbf16>, vector<8x128xf32> -> vector<8x128xf32>
      %22 = arith.addf %18, %21 : vector<8x128xf32>
      %c0_18 = arith.constant 0 : index
      %c0_19 = arith.constant 0 : index
      %23 = vector.load %arg7[%c0_18, %c0_19] : memref<1x128xf32, #tpu.memory_space<vmem>>, vector<1x128xf32>
      %24 = vector.broadcast %23 : vector<1x128xf32> to vector<8x128xf32>
      %25 = arith.addf %22, %24 : vector<8x128xf32>
      %cst_20 = arith.constant 0.000000e+00 : f32
      %26 = vector.broadcast %cst_20 : f32 to vector<8x128xf32>
      %27 = arith.maximumf %25, %26 : vector<8x128xf32>
      %28 = arith.truncf %27 : vector<8x128xf32> to vector<8x128xbf16>
      %c0_21 = arith.constant 0 : index
      %c0_22 = arith.constant 0 : index
      %29 = vector.load %arg8[%c0_21, %c0_22] : memref<128x128xbf16, #tpu.memory_space<vmem>>, vector<128x128xbf16>
      %cst_23 = arith.constant dense<0.000000e+00> : vector<8x128xf32>
      %30 = tpu.matmul %28, %29, %cst_23 {dimension_numbers = #tpu.dot_dimension_numbers<[1], [0], [0], [1], [0, 0, 1, 1], [], []>} : vector<8x128xbf16>, vector<128x128xbf16>, vector<8x128xf32> -> vector<8x128xf32>
      %c0_24 = arith.constant 0 : index
      %c0_25 = arith.constant 0 : index
      %31 = vector.load %arg9[%c0_24, %c0_25] : memref<1x128xf32, #tpu.memory_space<vmem>>, vector<1x128xf32>
      %32 = vector.broadcast %31 : vector<1x128xf32> to vector<8x128xf32>
      %33 = arith.addf %30, %32 : vector<8x128xf32>
      %cst_26 = arith.constant 0.000000e+00 : f32
      %34 = vector.broadcast %cst_26 : f32 to vector<8x128xf32>
      %35 = arith.maximumf %33, %34 : vector<8x128xf32>
      %36 = arith.truncf %35 : vector<8x128xf32> to vector<8x128xbf16>
      %c0_27 = arith.constant 0 : index
      %c0_28 = arith.constant 0 : index
      %37 = vector.load %arg10[%c0_27, %c0_28] : memref<128x1xbf16, #tpu.memory_space<vmem>>, vector<128x1xbf16>
      %cst_29 = arith.constant dense<0.000000e+00> : vector<8x1xf32>
      %38 = tpu.matmul %36, %37, %cst_29 {dimension_numbers = #tpu.dot_dimension_numbers<[1], [0], [0], [1], [0, 0, 1, 1], [], []>} : vector<8x128xbf16>, vector<128x1xbf16>, vector<8x1xf32> -> vector<8x1xf32>
      %c0_30 = arith.constant 0 : index
      %c0_31 = arith.constant 0 : index
      %39 = vector.load %arg11[%c0_30, %c0_31] : memref<1x1xf32, #tpu.memory_space<vmem>>, vector<1x1xf32>
      %40 = vector.broadcast %39 : vector<1x1xf32> to vector<8x1xf32>
      %41 = arith.addf %38, %40 : vector<8x1xf32>
      %c0_32 = arith.constant 0 : index
      %c0_33 = arith.constant 0 : index
      %42 = vector.load %arg13[%c0_32, %c0_33] : memref<8x1xf32, #tpu.memory_space<vmem>>, vector<8x1xf32>
      tpu.vector_store %arg13[%c0_32, %c0_33], %41 {strides = array<i32>} : memref<8x1xf32, #tpu.memory_space<vmem>>, vector<8x1xf32>,
    } else {
    }
    %c0 = arith.constant 0 : index
    %c0_1 = arith.constant 0 : index
    %3 = vector.load %arg13[%c0, %c0_1] : memref<8x1xf32, #tpu.memory_space<vmem>>, vector<8x1xf32>
    %c0_2 = arith.constant 0 : index
    %c0_3 = arith.constant 0 : index
    %4 = vector.load %arg4[%c0_2, %c0_3] : memref<1x128xf32, #tpu.memory_space<vmem>>, vector<1x128xf32>
    %5 = vector.broadcast %3 : vector<8x1xf32> to vector<8x128xf32>
    %6 = vector.broadcast %4 : vector<1x128xf32> to vector<8x128xf32>
    %7 = arith.addf %5, %6 : vector<8x128xf32>
    %cst = arith.constant 5.000000e-01 : f32
    %8 = vector.broadcast %cst : f32 to vector<8x128xf32>
    %9 = arith.mulf %8, %7 : vector<8x128xf32>
    %10 = math.tanh %9 : vector<8x128xf32>
    %cst_4 = arith.constant 5.000000e-01 : f32
    %11 = vector.broadcast %cst_4 : f32 to vector<8x128xf32>
    %12 = arith.mulf %11, %10 : vector<8x128xf32>
    %cst_5 = arith.constant 5.000000e-01 : f32
    %13 = vector.broadcast %cst_5 : f32 to vector<8x128xf32>
    %14 = arith.addf %12, %13 : vector<8x128xf32>
    %c0_6 = arith.constant 0 : index
    %c0_7 = arith.constant 0 : index
    %15 = vector.load %arg12[%c0_6, %c0_7] : memref<8x128xf32, #tpu.memory_space<vmem>>, vector<8x128xf32>
    tpu.vector_store %arg12[%c0_6, %c0_7], %14 {strides = array<i32>} : memref<8x128xf32, #tpu.memory_space<vmem>>, vector<8x128xf32>,
    return
  }
  func.func @transform_0(%arg0: i32, %arg1: i32) -> (i32, i32) {
    %c0_i32 = arith.constant 0 : i32
    %c0_i32_0 = arith.constant 0 : i32
    return %arg0, %c0_i32 : i32, i32
  }
  func.func @transform_1(%arg0: i32, %arg1: i32) -> (i32, i32) {
    %c0_i32 = arith.constant 0 : i32
    %c0_i32_0 = arith.constant 0 : i32
    return %arg0, %c0_i32 : i32, i32
  }
  func.func @transform_2(%arg0: i32, %arg1: i32) -> (i32, i32) {
    %c0_i32 = arith.constant 0 : i32
    %c0_i32_0 = arith.constant 0 : i32
    return %c0_i32, %arg1 : i32, i32
  }
  func.func @transform_3(%arg0: i32, %arg1: i32) -> (i32, i32) {
    %c0_i32 = arith.constant 0 : i32
    %c0_i32_0 = arith.constant 0 : i32
    %c0_i32_1 = arith.constant 0 : i32
    return %c0_i32, %c0_i32_0 : i32, i32
  }
  func.func @transform_4(%arg0: i32, %arg1: i32) -> (i32, i32) {
    %c0_i32 = arith.constant 0 : i32
    %c0_i32_0 = arith.constant 0 : i32
    %c0_i32_1 = arith.constant 0 : i32
    return %c0_i32, %c0_i32_0 : i32, i32
  }
  func.func @transform_5(%arg0: i32, %arg1: i32) -> (i32, i32) {
    %c0_i32 = arith.constant 0 : i32
    %c0_i32_0 = arith.constant 0 : i32
    %c0_i32_1 = arith.constant 0 : i32
    return %c0_i32, %c0_i32_0 : i32, i32
  }
  func.func @transform_6(%arg0: i32, %arg1: i32) -> (i32, i32) {
    %c0_i32 = arith.constant 0 : i32
    %c0_i32_0 = arith.constant 0 : i32
    %c0_i32_1 = arith.constant 0 : i32
    return %c0_i32, %c0_i32_0 : i32, i32
  }
  func.func @transform_7(%arg0: i32, %arg1: i32) -> (i32, i32) {
    %c0_i32 = arith.constant 0 : i32
    %c0_i32_0 = arith.constant 0 : i32
    %c0_i32_1 = arith.constant 0 : i32
    return %c0_i32, %c0_i32_0 : i32, i32
  }
  func.func @transform_8(%arg0: i32, %arg1: i32) -> (i32, i32) {
    %c0_i32 = arith.constant 0 : i32
    %c0_i32_0 = arith.constant 0 : i32
    %c0_i32_1 = arith.constant 0 : i32
    return %c0_i32, %c0_i32_0 : i32, i32
  }
  func.func @transform_9(%arg0: i32, %arg1: i32) -> (i32, i32) {
    %c0_i32 = arith.constant 0 : i32
    %c0_i32_0 = arith.constant 0 : i32
    %c0_i32_1 = arith.constant 0 : i32
    return %c0_i32, %c0_i32_0 : i32, i32
  }
  func.func @transform_10(%arg0: i32, %arg1: i32) -> (i32, i32) {
    %c0_i32 = arith.constant 0 : i32
    return %arg0, %arg1 : i32, i32
  }
}

</mosaic_0001>

<bundles_post_ra>
// kernel: ncf_forward.1
= control target key start
LH: loop header
LB: loop body
LE: loop exit
PB: predicated region body
PF: predicated region fallthrough
CT: control target
= control target key end

     0   :  { %s590_s0 = inlined_call_operand.vmem [shape: bf16[8,32], index: 0, kind: input, shape index: {}]   ;;  %s591_s1 = inlined_call_operand.vmem [shape: bf16[8,32], index: 1, kind: input, shape index: {}]   ;;  %s592_s2 = inlined_call_operand.vmem [shape: f32[1,128], index: 2, kind: input, shape index: {}]   ;;  %s593_s3 = inlined_call_operand.vmem [shape: bf16[32,128], index: 3, kind: input, shape index: {}]   ;;  %s594_s4 = inlined_call_operand.vmem [shape: bf16[32,128], index: 4, kind: input, shape index: {}]   ;;  %s595_s5 = inlined_call_operand.vmem [shape: f32[1,128], index: 5, kind: input, shape index: {}]   ;;  %s596_s6 = inlined_call_operand.vmem [shape: bf16[128,128], index: 6, kind: input, shape index: {}]   ;;  %s597_s7 = inlined_call_operand.vmem [shape: f32[1,128], index: 7, kind: input, shape index: {}]   ;;  %s598_s8 = inlined_call_operand.vmem [shape: bf16[128,1], index: 8, kind: input, shape index: {}]   ;;  %s599_s9 = inlined_call_operand.<no memory space> [shape: f32[1,1], index: 9, kind: input, shape index: {}]   ;;  %s600_s10 = inlined_call_operand.hbm [shape: f32[8,128], index: 10, kind: output, shape index: {}]  }
   0x1   :  { %v15_v0 = vstv %s599_s9 }
   0x2   :  { %16 = vst [vmem:[#allocation3] sm:$0x1] %v15_v0 }
   0x3   :  { %v400_v1 = vld [vmem:[%s594_s4 + $0x8] sm:$0xff]  ;;  %v399_v3 = vld [vmem:[%s594_s4] sm:$0xff]  ;;  %v408_v5 = vld [vmem:[%s596_s6 + $0x38] sm:$0xff] }
   0x4   :  { %v398_v2 = vld [vmem:[%s593_s3 + $0x8] sm:$0xff]  ;;  %75 = vmatpush.bf16.msra.mxu0 %v400_v1  ;;  %v397_v4 = vld [vmem:[%s593_s3] sm:$0xff]  ;;  %v407_v6 = vld [vmem:[%s596_s6 + $0x30] sm:$0xff]  ;;  %185 = vmatpush.bf16.msra.mxu2 %v408_v5 }
   0x5   :  { %103 = vmatpush.bf16.msra.mxu1 %v398_v2 }
   0x6   :  { %17 = vsyncpa [#allocation5], 0  ;;  %v48_v7 = vld [vmem:[%s591_s1] sm:$0xf]  ;;  %vm65_vm0 = vcmask 261120   ;;  %v406_v9 = vld [vmem:[%s596_s6 + $0x28] sm:$0xff] }
   0x7   :  { %v43_v8 = vld [vmem:[%s590_s0] sm:$0xf]  ;;  %v404_v11 = vld [vmem:[%s596_s6 + $0x18] sm:$0xff]  ;;  %v403_v12 = vld [vmem:[%s596_s6 + $0x10] sm:$0xff]  ;;  %v452_v38 = vmov 0   ;;  %vm281_vm1 = vcmask 7168  }
   0x8   :  { %76 = vmatpush.bf16.msra.mxu0 %v399_v3  ;;  %186 = vmatpush.bf16.msra.mxu2 %v407_v6  ;;  %v405_v10 = vld [vmem:[%s596_s6 + $0x20] sm:$0xff]  ;;  %v402_v13 = vld [vmem:[%s596_s6 + $0x8] sm:$0xff]  ;;  %v416_v15 = vld [vmem:[%s598_s8 + $0x38] sm:$0xff]  ;;  %s306_s15 = sshll.u32 %s600_s10, 4  ;;  %s307_s15 = int_to_ptr.hbm [resolvable:$true] %s306_s15 }
   0x9   :  { %104 = vmatpush.bf16.msra.mxu1 %v397_v4  ;;  %v401_v14 = vld [vmem:[%s596_s6] sm:$0xff]  ;;  %268 = vmatpush.bf16.msra.mxu3 %v416_v15  ;;  %v415_v16 = vld [vmem:[%s598_s8 + $0x30] sm:$0xff]  ;;  %v414_v17 = vld [vmem:[%s598_s8 + $0x28] sm:$0xff] }
   0xa   :  { %v413_v18 = vld [vmem:[%s598_s8 + $0x20] sm:$0xff]  ;;  %v412_v19 = vld [vmem:[%s598_s8 + $0x18] sm:$0xff]  ;;  %v411_v20 = vld [vmem:[%s598_s8 + $0x10] sm:$0xff]  ;;  %419 = vset.pattern.permute.xlu0 %v452_v38 }
   0xb   :  { %323 = vmatmul.msk.bf16.vlgmr.msra.gmra.mxu0 %vm65_vm0, %v48_v7  ;;  %v420_v21 = vld [vmem:[%s595_s5] ss:$0 sm:$0xff]  ;;  %v410_v30 = vld [vmem:[%s598_s8 + $0x8] sm:$0xff] }
   0xc   :  { %332 = vmatmul.msk.bf16.vlgmr.msra.gmra.mxu1 %vm65_vm0, %v43_v8  ;;  %187 = vmatpush.bf16.msra.mxu2 %v406_v9  ;;  %v409_v31 = vld [vmem:[%s598_s8] sm:$0xff]  ;;  %v422_v39 = vld [vmem:[#allocation3] ss:$0 sm:$0xff] }
   0xd   :  { %269 = vmatpush.bf16.msra.mxu3 %v415_v16  ;;  %v421_v32 = vld [vmem:[%s597_s7] ss:$0 sm:$0xff]  ;;  %s453_s7 = smov [#allocation4]  }
   0xe   :  { %v423_v44 = vld [vmem:[%s592_s2] ss:$0 sm:$0xff]  ;;  %s304_s13 = sshll.u32 %s453_s7, 4  ;;  %s305_s13 = int_to_ptr.vmem [resolvable:$true] %s304_s13 }
  0x10   :  { %188 = vmatpush.bf16.msra.mxu2 %v405_v10 }
  0x11   :  { %270 = vmatpush.bf16.msra.mxu3 %v414_v17 }
  0x14   :  { %189 = vmatpush.bf16.msra.mxu2 %v404_v11 }
  0x15   :  { %271 = vmatpush.bf16.msra.mxu3 %v413_v18 }
  0x18   :  { %190 = vmatpush.bf16.msra.mxu2 %v403_v12 }
  0x19   :  { %272 = vmatpush.bf16.msra.mxu3 %v412_v19 }
  0x1c   :  { %191 = vmatpush.bf16.msra.mxu2 %v402_v13 }
  0x1d   :  { %273 = vmatpush.bf16.msra.mxu3 %v411_v20 }
  0x20   :  { %192 = vmatpush.bf16.msra.mxu2 %v401_v14 }
  0x21   :  { %274 = vmatpush.bf16.msra.mxu3 %v410_v30 }
  0x25   :  { %275 = vmatpush.bf16.msra.mxu3 %v409_v31 }
  0x88   :  { %v78_v22 = vpop.f32.mrf.mxu0 }
  0x89   :  { %v106_v23 = vpop.f32.mrf.mxu1 }
  0x8a   :  { %v107_v24 = vadd.f32 %v106_v23, %v78_v22 }
  0x8c   :  { %v114_v25 = vadd.f32 %v420_v21, %v107_v24 }
  0x8e   :  { %v115_v26 = vmax.f32 %v114_v25, 0.0 }
  0x90   :  { %v116_v27 = vpack.c.bf16 %v115_v26, %v115_v26  ;;  %v80_v28 = vpop.f32.mrf.mxu0 }
  0x91   :  { %v108_v29 = vpop.f32.mrf.mxu1 }
  0x92   :  { %193 = vmatmul.bf16.vlgmr.msra.gmra.mxu2 %v116_v27 }
 0x115   :  { %v194_v33 = vpop.f32.mrf.mxu2 }
 0x116   :  { %v195_v34 = vadd.f32 %v421_v32, %v194_v33 }
 0x118   :  { %v198_v35 = vmax.f32 %v195_v34, 0.0 }
 0x11a   :  { %v199_v36 = vpack.c.bf16 %v198_v35, %v198_v35 }
 0x11c   :  { %276 = vmatmul.bf16.vlgmr.msra.gmra.mxu3 %v199_v36 }
 0x11d   :  { %v196_v37 = vpop.f32.mrf.mxu2 }
 0x19f   :  { %v277_v40 = vpop.f32.mrf.mxu3 }
 0x1a0   :  { %v278_v41 = vadd.f32 %v422_v39, %v277_v40 }
 0x1a2   :  { %282 = vst.msk [vmem:[#allocation2] sm:$0xff] %vm281_vm1, %v278_v41 }
 0x1a7   :  { %v279_v42 = vpop.f32.mrf.mxu3 }
 0x1a9   :  { %v283_v43 = vld [vmem:[#allocation2] sm:$0xff] }
 0x1aa   :  { %287 = vperm.xlu0 %419, %v283_v43  }
 0x21c   :  { %v288_v45 = vpop.permute.xlu0 %287 }
 0x21d   :  { %v293_v46 = vadd.f32 %v423_v44, %v288_v45 }
 0x21f   :  { %v294_v47 = vmul.f32 0.5, %v293_v46 }
 0x221   :  { %424 = vtanh.f32 %v294_v47 }
 0x227   :  { %v425_v48 = vpop.eup %424 }
 0x228   :  { %v296_v49 = vmul.f32 0.5, %v425_v48 }
 0x22a   :  { %v297_v50 = vadd.f32 0.5, %v296_v49 }
 0x22c   :  { %298 = vst [vmem:[#allocation4] sm:$0xff] %v297_v50 }
 0x22d   :  { %309 = dma.vmem_to_hbm [thread:$0]  %s305_s13, 128, %s307_s15, [#allocation5]  }
 0x22e   :  { %450 = dma.done.wait [#allocation5], 128  }
 0x22f   :  { %451 = vsyncadd [#allocation5], 4294967168 }
 0x230   :  { %314 = vsyncpa [#allocation5], 1 }

</bundles_post_ra>
